<compile_context>
chip_gen: v5e
topology: v5e:2x2
jax: 0.10.0
libtpu: 0.0.40
codegen_flags: <defaults>
</compile_context>

<pallas_src>
import functools

import jax
import jax.numpy as jnp
from jax import lax
from jax.experimental import pallas as pl
from jax.experimental.pallas import tpu as pltpu

EPS = 1e-5
LANE = 128
SUBLANE = 8
VMEM_LIMIT_BYTES = 64 * 1024 * 1024   # explicit; >= scoped default on all gens
VMEM_BUDGET_BYTES = 24 * 1024 * 1024  # working-set target used to derive tile_m


def _round_up(x, m):
    return (x + m - 1) // m * m


# ---------------- Pass 1 (recompute path): per-channel stat accumulation ----
def stats_kernel(x_ref, w_ref, sum_ref, sq_ref):
    # (tm, 9*Cin) bf16 @ (9*Cin, Cout_p) bf16 -> f32 on the MXU.
    acc = jnp.dot(x_ref[...], w_ref[...], preferred_element_type=jnp.float32)

    @pl.when(pl.program_id(0) == 0)
    def _():
        sum_ref[...] = jnp.zeros_like(sum_ref)
        sq_ref[...] = jnp.zeros_like(sq_ref)

    sum_ref[...] += jnp.sum(acc, axis=0, keepdims=True)
    sq_ref[...] += jnp.sum(acc * acc, axis=0, keepdims=True)


# ---------------- Pass 2 (recompute path): conv + fused BN FMA + ReLU --------
def conv_bn_relu_kernel(x_ref, w_ref, sum_ref, sq_ref, gamma_ref, beta_ref,
                        o_ref, *, inv_count):
    acc = jnp.dot(x_ref[...], w_ref[...], preferred_element_type=jnp.float32)
    mean = sum_ref[...] * inv_count
    var = jnp.maximum(sq_ref[...] * inv_count - mean * mean, 0.0)
    scale = gamma_ref[...] * lax.rsqrt(var + EPS)
    shift = beta_ref[...] - mean * scale
    o_ref[...] = jnp.maximum(acc * scale + shift, 0.0).astype(o_ref.dtype)


# ---------------- Fallback pass 1: conv (bf16 store) + stats -----------------
def conv_stats_kernel(x_ref, w_ref, conv_ref, sum_ref, sq_ref):
    acc = jnp.dot(x_ref[...], w_ref[...], preferred_element_type=jnp.float32)
    conv_ref[...] = acc.astype(conv_ref.dtype)   # bf16 intermediate

    @pl.when(pl.program_id(0) == 0)
    def _():
        sum_ref[...] = jnp.zeros_like(sum_ref)
        sq_ref[...] = jnp.zeros_like(sq_ref)

    sum_ref[...] += jnp.sum(acc, axis=0, keepdims=True)
    sq_ref[...] += jnp.sum(acc * acc, axis=0, keepdims=True)


# ---------------- Fallback pass 2: BN FMA + ReLU on bf16 intermediate --------
def bn_relu_kernel(conv_ref, sum_ref, sq_ref, gamma_ref, beta_ref, o_ref, *,
                   inv_count):
    conv = conv_ref[...].astype(jnp.float32)
    mean = sum_ref[...] * inv_count
    var = jnp.maximum(sq_ref[...] * inv_count - mean * mean, 0.0)
    scale = gamma_ref[...] * lax.rsqrt(var + EPS)
    shift = beta_ref[...] - mean * scale
    o_ref[...] = jnp.maximum(conv * scale + shift, 0.0).astype(o_ref.dtype)


def basic_block_forward(x_nchw, weight, bias, gamma, beta, *, tile_m=512):
    """x_nchw: (N, Cin, H, W); weight: (Cout, Cin, 3, 3) (PyTorch layout)."""
    del bias  # per-channel conv bias cancels exactly under training-mode BN
    n, cin, h, w = x_nchw.shape
    cout = weight.shape[0]
    m = n * h * w
    k9 = 9 * cin
    cout_p = _round_up(cout, LANE)        # lane-dense output stores

    # ----- tile_m from the VMEM budget ---------------------------------------
    # per grid step: double-buffered bf16 LHS (tm, k9) + resident bf16 RHS
    # (k9, cout_p) + double-buffered f32 output tile (tm, cout_p)
    # (+ bf16 conv tile on the fallback path, covered by the same budget).
    per_row = 2 * (k9 * 2) + 2 * (cout_p * 4) + 2 * (cout_p * 2)
    resident = k9 * cout_p * 2
    tm_budget = max(SUBLANE, (VMEM_BUDGET_BYTES - resident) // max(per_row, 1))
    tm = min(tile_m, int(tm_budget))
    tm = max(SUBLANE, (tm // SUBLANE) * SUBLANE)
    if m < tm:
        tm = _round_up(m, SUBLANE)
    m_pad = _round_up(m, tm)
    n_tiles = m_pad // tm

    # ----- glue: NCHW -> NHWC (bf16), spatial pad, fold 3x3 taps into lanes ---
    x_nhwc = jnp.transpose(x_nchw, (0, 2, 3, 1)).astype(jnp.bfloat16)
    x_sp = jnp.pad(x_nhwc, ((0, 0), (1, 1), (1, 1), (0, 0)))
    cols = [
        x_sp[:, dy:dy + h, dx:dx + w, :].reshape(m, cin)
        for dy in range(3) for dx in range(3)
    ]
    x_cols = jnp.concatenate(cols, axis=1)                       # (M, 9*Cin) bf16
    x_cols = jnp.pad(x_cols, ((0, m_pad - m), (0, 0)))

    # weight (Cout, Cin, 3, 3) -> (9*Cin, Cout_p); row order (dy, dx, cin)
    # matches the tap concatenation above.
    w_mat = jnp.transpose(weight, (2, 3, 1, 0)).reshape(k9, cout)
    w_mat = jnp.pad(w_mat, ((0, 0), (0, cout_p - cout))).astype(jnp.bfloat16)

    gamma_p = jnp.pad(gamma.astype(jnp.float32), (0, cout_p - cout)).reshape(1, cout_p)
    beta_p = jnp.pad(beta.astype(jnp.float32), (0, cout_p - cout)).reshape(1, cout_p)

    inv_count = 1.0 / float(m)
    cparams_arb = pltpu.CompilerParams(
        dimension_semantics=("arbitrary",), vmem_limit_bytes=VMEM_LIMIT_BYTES)
    cparams_par = pltpu.CompilerParams(
        dimension_semantics=("parallel",), vmem_limit_bytes=VMEM_LIMIT_BYTES)

    # Recompute path when an extra x_cols read (9*Cin*2 B/pixel) is cheaper
    # than a bf16 conv-intermediate round trip (4*Cout_p B/pixel).
    recompute = (18 * cin) <= (4 * cout_p)

    if recompute:
        # --- pass 1: batch statistics only (no big intermediate) -------------
        csum, csq = pl.pallas_call(
            stats_kernel,
            out_shape=(
                jax.ShapeDtypeStruct((1, cout_p), jnp.float32),
                jax.ShapeDtypeStruct((1, cout_p), jnp.float32),
            ),
            grid=(n_tiles,),
            in_specs=[
                pl.BlockSpec((tm, k9), lambda i: (i, 0)),
                pl.BlockSpec((k9, cout_p), lambda i: (0, 0)),
            ],
            out_specs=(
                pl.BlockSpec((1, cout_p), lambda i: (0, 0)),   # grid-resident acc
                pl.BlockSpec((1, cout_p), lambda i: (0, 0)),   # grid-resident acc
            ),
            compiler_params=cparams_arb,
        )(x_cols, w_mat)

        # --- pass 2: recompute conv, fused BN FMA + ReLU ----------------------
        out2d = pl.pallas_call(
            functools.partial(conv_bn_relu_kernel, inv_count=inv_count),
            out_shape=jax.ShapeDtypeStruct((m_pad, cout_p), jnp.float32),
            grid=(n_tiles,),
            in_specs=[
                pl.BlockSpec((tm, k9), lambda i: (i, 0)),
                pl.BlockSpec((k9, cout_p), lambda i: (0, 0)),
                pl.BlockSpec((1, cout_p), lambda i: (0, 0)),
                pl.BlockSpec((1, cout_p), lambda i: (0, 0)),
                pl.BlockSpec((1, cout_p), lambda i: (0, 0)),
                pl.BlockSpec((1, cout_p), lambda i: (0, 0)),
            ],
            out_specs=pl.BlockSpec((tm, cout_p), lambda i: (i, 0)),
            compiler_params=cparams_par,
        )(x_cols, w_mat, csum, csq, gamma_p, beta_p)
    else:
        # --- fallback: two passes with a bf16 conv intermediate --------------
        conv, csum, csq = pl.pallas_call(
            conv_stats_kernel,
            out_shape=(
                jax.ShapeDtypeStruct((m_pad, cout_p), jnp.bfloat16),
                jax.ShapeDtypeStruct((1, cout_p), jnp.float32),
                jax.ShapeDtypeStruct((1, cout_p), jnp.float32),
            ),
            grid=(n_tiles,),
            in_specs=[
                pl.BlockSpec((tm, k9), lambda i: (i, 0)),
                pl.BlockSpec((k9, cout_p), lambda i: (0, 0)),
            ],
            out_specs=(
                pl.BlockSpec((tm, cout_p), lambda i: (i, 0)),
                pl.BlockSpec((1, cout_p), lambda i: (0, 0)),
                pl.BlockSpec((1, cout_p), lambda i: (0, 0)),
            ),
            compiler_params=cparams_arb,
        )(x_cols, w_mat)

        out2d = pl.pallas_call(
            functools.partial(bn_relu_kernel, inv_count=inv_count),
            out_shape=jax.ShapeDtypeStruct((m_pad, cout_p), jnp.float32),
            grid=(n_tiles,),
            in_specs=[
                pl.BlockSpec((tm, cout_p), lambda i: (i, 0)),
                pl.BlockSpec((1, cout_p), lambda i: (0, 0)),
                pl.BlockSpec((1, cout_p), lambda i: (0, 0)),
                pl.BlockSpec((1, cout_p), lambda i: (0, 0)),
                pl.BlockSpec((1, cout_p), lambda i: (0, 0)),
            ],
            out_specs=pl.BlockSpec((tm, cout_p), lambda i: (i, 0)),
            compiler_params=cparams_par,
        )(conv, csum, csq, gamma_p, beta_p)

    # --- glue back: (M, Cout_p) -> NCHW ---------------------------------------
    # NOTE: the channels-last -> channels-first transpose below is a separate
    # strided XLA pass (~full extra HBM read+write); callers able to consume
    # NHWC should take `out2d[:m, :cout].reshape(n, h, w, cout)` directly.
    out = out2d[:m, :cout].reshape(n, h, w, cout)
    return jnp.transpose(out, (0, 3, 1, 2))


def reference_forward(x_nchw, weight, bias, gamma, beta):
    """Pure-JAX f32 reference mirroring the PyTorch BasicBlock (training BN)."""
    conv = lax.conv_general_dilated(
        x_nchw.astype(jnp.float32),
        weight.astype(jnp.float32),
        window_strides=(1, 1),
        padding=((1, 1), (1, 1)),
        dimension_numbers=("NCHW", "OIHW", "NCHW"),
    )
    conv = conv + bias.reshape(1, -1, 1, 1)
    mean = jnp.mean(conv, axis=(0, 2, 3), keepdims=True)
    var = jnp.mean((conv - mean) ** 2, axis=(0, 2, 3), keepdims=True)
    y = (conv - mean) * lax.rsqrt(var + EPS)
    y = y * gamma.reshape(1, -1, 1, 1) + beta.reshape(1, -1, 1, 1)
    return jnp.maximum(y, 0.0)


if __name__ == "__main__":
    N, CIN, COUT, H, W = 2, 4, 8, 16, 16

    key = jax.random.PRNGKey(0)
    kx, kw, kb, kg, kbeta = jax.random.split(key, 5)

    x = jax.random.normal(kx, (N, CIN, H, W), dtype=jnp.float32)
    weight = 0.1 * jax.random.normal(kw, (COUT, CIN, 3, 3), dtype=jnp.float32)
    bias = 0.1 * jax.random.normal(kb, (COUT,), dtype=jnp.float32)
    gamma = 1.0 + 0.1 * jax.random.normal(kg, (COUT,), dtype=jnp.float32)
    beta = 0.05 * jax.random.normal(kbeta, (COUT,), dtype=jnp.float32)

    out = jax.block_until_ready(basic_block_forward(x, weight, bias, gamma, beta))
    ref = jax.block_until_ready(reference_forward(x, weight, bias, gamma, beta))

    max_diff = float(jnp.max(jnp.abs(out - ref)))
    assert out.shape == (N, COUT, H, W), out.shape
    # bf16 matmul inputs (f32 accumulation) -> loosened tolerance vs f32 ref.
    assert max_diff < 5e-2, f"mismatch vs reference: {max_diff}"

    print("KERNEL_OK")
</pallas_src>

<mosaic_0001>
module attributes {stable_mosaic.version = 11 : i64} {
  func.func @stats_kernel(%arg0: i32, %arg1: memref<512x36xbf16, #tpu.memory_space<vmem>>, %arg2: memref<36x128xbf16, #tpu.memory_space<vmem>>, %arg3: memref<1x128xf32, #tpu.memory_space<vmem>>, %arg4: memref<1x128xf32, #tpu.memory_space<vmem>>) attributes {dimension_semantics = [#tpu.dimension_semantics<arbitrary>], iteration_bounds = array<i64: 1>, scalar_prefetch = 0 : i64, scratch_operands = 0 : i64, tpu.core_type = #tpu.core_type<tc>, window_params = [{transform_indices = @transform_0, window_bounds = array<i64: 512, 36>}, {pipeline_mode = #tpu.pipeline_mode<synchronous>, transform_indices = @transform_1, window_bounds = array<i64: 36, 128>}, {pipeline_mode = #tpu.pipeline_mode<synchronous>, transform_indices = @transform_2, window_bounds = array<i64: 1, 128>}, {pipeline_mode = #tpu.pipeline_mode<synchronous>, transform_indices = @transform_3, window_bounds = array<i64: 1, 128>}]} {
    %c0 = arith.constant 0 : index
    %c0_0 = arith.constant 0 : index
    %0 = vector.load %arg1[%c0, %c0_0] : memref<512x36xbf16, #tpu.memory_space<vmem>>, vector<512x36xbf16>
    %c0_1 = arith.constant 0 : index
    %c0_2 = arith.constant 0 : index
    %1 = vector.load %arg2[%c0_1, %c0_2] : memref<36x128xbf16, #tpu.memory_space<vmem>>, vector<36x128xbf16>
    %cst = arith.constant dense<0.000000e+00> : vector<512x128xf32>
    %2 = tpu.matmul %0, %1, %cst {dimension_numbers = #tpu.dot_dimension_numbers<[1], [0], [0], [1], [0, 0, 1, 1], [], []>} : vector<512x36xbf16>, vector<36x128xbf16>, vector<512x128xf32> -> vector<512x128xf32>
    %c0_i32 = arith.constant 0 : i32
    %3 = arith.cmpi eq, %arg0, %c0_i32 : i32
    %4 = arith.extui %3 : i1 to i32
    %c0_i32_3 = arith.constant 0 : i32
    %5 = arith.cmpi ne, %4, %c0_i32_3 : i32
    scf.if %5 {
      %cst_14 = arith.constant 0.000000e+00 : f32
      %17 = vector.broadcast %cst_14 : f32 to vector<1x128xf32>
      %c0_15 = arith.constant 0 : index
      %c0_16 = arith.constant 0 : index
      %18 = vector.load %arg3[%c0_15, %c0_16] : memref<1x128xf32, #tpu.memory_space<vmem>>, vector<1x128xf32>
      tpu.vector_store %arg3[%c0_15, %c0_16], %17 {strides = array<i32>} : memref<1x128xf32, #tpu.memory_space<vmem>>, vector<1x128xf32>,
      %cst_17 = arith.constant 0.000000e+00 : f32
      %19 = vector.broadcast %cst_17 : f32 to vector<1x128xf32>
      %c0_18 = arith.constant 0 : index
      %c0_19 = arith.constant 0 : index
      %20 = vector.load %arg4[%c0_18, %c0_19] : memref<1x128xf32, #tpu.memory_space<vmem>>, vector<1x128xf32>
      tpu.vector_store %arg4[%c0_18, %c0_19], %19 {strides = array<i32>} : memref<1x128xf32, #tpu.memory_space<vmem>>, vector<1x128xf32>,
    } else {
    }
    %c0_4 = arith.constant 0 : index
    %c0_5 = arith.constant 0 : index
    %6 = vector.load %arg3[%c0_4, %c0_5] : memref<1x128xf32, #tpu.memory_space<vmem>>, vector<1x128xf32>
    %cst_6 = arith.constant dense<0.000000e+00> : vector<128xf32>
    %7 = vector.multi_reduction <add>, %2, %cst_6 [0] : vector<512x128xf32> to vector<128xf32>
    %8 = vector.shape_cast %7 : vector<128xf32> to vector<1x128xf32>
    %9 = arith.addf %6, %8 : vector<1x128xf32>
    %c0_7 = arith.constant 0 : index
    %c0_8 = arith.constant 0 : index
    %10 = vector.load %arg3[%c0_7, %c0_8] : memref<1x128xf32, #tpu.memory_space<vmem>>, vector<1x128xf32>
    tpu.vector_store %arg3[%c0_7, %c0_8], %9 {strides = array<i32>} : memref<1x128xf32, #tpu.memory_space<vmem>>, vector<1x128xf32>,
    %c0_9 = arith.constant 0 : index
    %c0_10 = arith.constant 0 : index
    %11 = vector.load %arg4[%c0_9, %c0_10] : memref<1x128xf32, #tpu.memory_space<vmem>>, vector<1x128xf32>
    %12 = arith.mulf %2, %2 : vector<512x128xf32>
    %cst_11 = arith.constant dense<0.000000e+00> : vector<128xf32>
    %13 = vector.multi_reduction <add>, %12, %cst_11 [0] : vector<512x128xf32> to vector<128xf32>
    %14 = vector.shape_cast %13 : vector<128xf32> to vector<1x128xf32>
    %15 = arith.addf %11, %14 : vector<1x128xf32>
    %c0_12 = arith.constant 0 : index
    %c0_13 = arith.constant 0 : index
    %16 = vector.load %arg4[%c0_12, %c0_13] : memref<1x128xf32, #tpu.memory_space<vmem>>, vector<1x128xf32>
    tpu.vector_store %arg4[%c0_12, %c0_13], %15 {strides = array<i32>} : memref<1x128xf32, #tpu.memory_space<vmem>>, vector<1x128xf32>,
    return
  }
  func.func @transform_0(%arg0: i32) -> (i32, i32) {
    %c0_i32 = arith.constant 0 : i32
    %c0_i32_0 = arith.constant 0 : i32
    return %arg0, %c0_i32 : i32, i32
  }
  func.func @transform_1(%arg0: i32) -> (i32, i32) {
    %c0_i32 = arith.constant 0 : i32
    %c0_i32_0 = arith.constant 0 : i32
    %c0_i32_1 = arith.constant 0 : i32
    return %c0_i32, %c0_i32_0 : i32, i32
  }
  func.func @transform_2(%arg0: i32) -> (i32, i32) {
    %c0_i32 = arith.constant 0 : i32
    %c0_i32_0 = arith.constant 0 : i32
    %c0_i32_1 = arith.constant 0 : i32
    return %c0_i32, %c0_i32_0 : i32, i32
  }
  func.func @transform_3(%arg0: i32) -> (i32, i32) {
    %c0_i32 = arith.constant 0 : i32
    %c0_i32_0 = arith.constant 0 : i32
    %c0_i32_1 = arith.constant 0 : i32
    return %c0_i32, %c0_i32_0 : i32, i32
  }
}

</mosaic_0001>

<bundles_post_ra>
// kernel: tpu_custom_call.1
= control target key start
LH: loop header
LB: loop body
LE: loop exit
PB: predicated region body
PF: predicated region fallthrough
CT: control target
= control target key end

     0   :  { %9 = vsyncpa [#allocation3], 0  ;;  %vm357_vm0 = vcmask 1041408   ;;  %s1378_s0 = inlined_call_operand.vmem [shape: bf16[512,36], index: 0, kind: input, shape index: {}]   ;;  %s1379_s1 = inlined_call_operand.vmem [shape: bf16[36,128], index: 1, kind: input, shape index: {}]   ;;  %s1380_s2 = inlined_call_operand.hbm [shape: f32[1,128], index: 2, kind: output, shape index: {0}]   ;;  %s1381_s3 = inlined_call_operand.hbm [shape: f32[1,128], index: 3, kind: output, shape index: {1}]  }
   0x1   :  { %v84_v0 = vld [vmem:[%s1379_s1 + $0x10] sm:$0x3] }
   0x2   :  { %v254_v1 = vunpack.c.l.b16 %v84_v0 }
   0x3   :  { %10 = vsyncpa [#allocation5], 0  ;;  %v977_v4 = vld [vmem:[%s1379_s1 + $0x8] sm:$0xff]  ;;  %v976_v5 = vld [vmem:[%s1379_s1] sm:$0xff]  ;;  %vm260_vm1 = vcmask 293888   ;;  %s751_s28 = sshll.u32 %s1380_s2, 4  ;;  %s752_s28 = int_to_ptr.hbm [resolvable:$true] %s751_s28 }
   0x4   :  { %v257_v2 = vpack.c.b16 %v254_v1, %v254_v1  ;;  %v944_v6 = vld [vmem:[%s1378_s0] sm:$0xff]  ;;  %v945_v8 = vld [vmem:[%s1378_s0 + $0x8] sm:$0xff]  ;;  %v946_v11 = vld [vmem:[%s1378_s0 + $0x10] sm:$0xff]  ;;  %s1044_s29 = smov [#allocation4]   ;;  %s762_s6 = sshll.u32 %s1381_s3, 4  ;;  %s763_s6 = int_to_ptr.hbm [resolvable:$true] %s762_s6 }
   0x5   :  { %v952_v7 = vld [vmem:[%s1378_s0 + $0x40] sm:$0xff]  ;;  %v953_v9 = vld [vmem:[%s1378_s0 + $0x48] sm:$0xff]  ;;  %v954_v12 = vld [vmem:[%s1378_s0 + $0x50] sm:$0xff]  ;;  %s760_s30 = sshll.u32 %s1044_s29, 4  ;;  %s761_s30 = int_to_ptr.vmem [resolvable:$true] %s760_s30 }
   0x6   :  { %v359_v3 = vsel %vm357_vm0, %v257_v2, 0  ;;  %v960_v10 = vld [vmem:[%s1378_s0 + $0x80] sm:$0xff]  ;;  %v961_v13 = vld [vmem:[%s1378_s0 + $0x88] sm:$0xff]  ;;  %v947_v14 = vld [vmem:[%s1378_s0 + $0x18] sm:$0xff] }
   0x7   :  { %366 = vmatpush.bf16.msra.mxu0 %v359_v3  ;;  %978 = vmatpush.bf16.msra.mxu1 %v359_v3  ;;  %v955_v15 = vld [vmem:[%s1378_s0 + $0x58] sm:$0xff]  ;;  %v962_v16 = vld [vmem:[%s1378_s0 + $0x90] sm:$0xff]  ;;  %v968_v17 = vld [vmem:[%s1378_s0 + $0xc0] sm:$0xff] }
   0x8   :  { %979 = vmatpush.bf16.msra.mxu2 %v359_v3  ;;  %980 = vmatpush.bf16.msra.mxu3 %v359_v3  ;;  %v948_v18 = vld [vmem:[%s1378_s0 + $0x20] sm:$0xff]  ;;  %v963_v20 = vld [vmem:[%s1378_s0 + $0x98] sm:$0xff]  ;;  %v969_v21 = vld [vmem:[%s1378_s0 + $0xc8] sm:$0xff] }
   0x9   :  { %v956_v19 = vld [vmem:[%s1378_s0 + $0x60] sm:$0xff]  ;;  %v949_v22 = vld [vmem:[%s1378_s0 + $0x28] sm:$0xff]  ;;  %v970_v25 = vld [vmem:[%s1378_s0 + $0xd0] sm:$0xff] }
   0xa   :  { %v957_v23 = vld [vmem:[%s1378_s0 + $0x68] sm:$0xff]  ;;  %v964_v24 = vld [vmem:[%s1378_s0 + $0xa0] sm:$0xff]  ;;  %v950_v26 = vld [vmem:[%s1378_s0 + $0x30] sm:$0xff] }
   0xb   :  { %367 = vmatpush.bf16.msra.mxu0 %v977_v4  ;;  %981 = vmatpush.bf16.msra.mxu1 %v977_v4  ;;  %v958_v27 = vld [vmem:[%s1378_s0 + $0x70] sm:$0xff]  ;;  %v965_v28 = vld [vmem:[%s1378_s0 + $0xa8] sm:$0xff]  ;;  %v971_v29 = vld [vmem:[%s1378_s0 + $0xd8] sm:$0xff] }
   0xc   :  { %982 = vmatpush.bf16.msra.mxu2 %v977_v4  ;;  %983 = vmatpush.bf16.msra.mxu3 %v977_v4  ;;  %v951_v30 = vld [vmem:[%s1378_s0 + $0x38] sm:$0xff]  ;;  %v966_v32 = vld [vmem:[%s1378_s0 + $0xb0] sm:$0xff]  ;;  %v972_v33 = vld [vmem:[%s1378_s0 + $0xe0] sm:$0xff] }
   0xd   :  { %v959_v31 = vld [vmem:[%s1378_s0 + $0x78] sm:$0xff]  ;;  %v973_v37 = vld [vmem:[%s1378_s0 + $0xe8] sm:$0xff]  ;;  %v974_v48 = vld [vmem:[%s1378_s0 + $0xf0] sm:$0xff] }
   0xe   :  { %v967_v36 = vld [vmem:[%s1378_s0 + $0xb8] sm:$0xff] }
   0xf   :  { %368 = vmatpush.bf16.msra.mxu0 %v976_v5  ;;  %984 = vmatpush.bf16.msra.mxu1 %v976_v5  ;;  %v975_v60 = vld [vmem:[%s1378_s0 + $0xf8] sm:$0xff]  ;;  %s1043_s0 = smov [#allocation2]  }
  0x10   :  { %985 = vmatpush.bf16.msra.mxu2 %v976_v5  ;;  %986 = vmatpush.bf16.msra.mxu3 %v976_v5  ;;  %s749_s25 = sshll.u32 %s1043_s0, 4  ;;  %s750_s25 = int_to_ptr.vmem [resolvable:$true] %s749_s25 }
  0x12   :  { %912 = vmatmul.msk.bf16.vlgmr.msra.gmra.mxu0 %vm260_vm1, %v944_v6  ;;  %920 = vmatmul.msk.bf16.vlgmr.msra.gmra.mxu1 %vm260_vm1, %v952_v7 }
  0x13   :  { %928 = vmatmul.msk.bf16.vlgmr.msra.gmra.mxu2 %vm260_vm1, %v960_v10  ;;  %936 = vmatmul.msk.bf16.vlgmr.msra.gmra.mxu3 %vm260_vm1, %v968_v17 }
  0x22   :  { %913 = vmatmul.msk.bf16.gmra.mxu0 %vm260_vm1, %v945_v8  ;;  %921 = vmatmul.msk.bf16.gmra.mxu1 %vm260_vm1, %v953_v9 }
  0x23   :  { %929 = vmatmul.msk.bf16.gmra.mxu2 %vm260_vm1, %v961_v13  ;;  %937 = vmatmul.msk.bf16.gmra.mxu3 %vm260_vm1, %v969_v21 }
  0x32   :  { %914 = vmatmul.msk.bf16.gmra.mxu0 %vm260_vm1, %v946_v11  ;;  %922 = vmatmul.msk.bf16.gmra.mxu1 %vm260_vm1, %v954_v12 }
  0x33   :  { %930 = vmatmul.msk.bf16.gmra.mxu2 %vm260_vm1, %v962_v16  ;;  %938 = vmatmul.msk.bf16.gmra.mxu3 %vm260_vm1, %v970_v25 }
  0x42   :  { %915 = vmatmul.msk.bf16.gmra.mxu0 %vm260_vm1, %v947_v14  ;;  %923 = vmatmul.msk.bf16.gmra.mxu1 %vm260_vm1, %v955_v15 }
  0x43   :  { %931 = vmatmul.msk.bf16.gmra.mxu2 %vm260_vm1, %v963_v20  ;;  %939 = vmatmul.msk.bf16.gmra.mxu3 %vm260_vm1, %v971_v29 }
  0x52   :  { %916 = vmatmul.msk.bf16.gmra.mxu0 %vm260_vm1, %v948_v18  ;;  %924 = vmatmul.msk.bf16.gmra.mxu1 %vm260_vm1, %v956_v19 }
  0x53   :  { %932 = vmatmul.msk.bf16.gmra.mxu2 %vm260_vm1, %v964_v24  ;;  %940 = vmatmul.msk.bf16.gmra.mxu3 %vm260_vm1, %v972_v33 }
  0x62   :  { %917 = vmatmul.msk.bf16.gmra.mxu0 %vm260_vm1, %v949_v22  ;;  %925 = vmatmul.msk.bf16.gmra.mxu1 %vm260_vm1, %v957_v23 }
  0x63   :  { %933 = vmatmul.msk.bf16.gmra.mxu2 %vm260_vm1, %v965_v28  ;;  %941 = vmatmul.msk.bf16.gmra.mxu3 %vm260_vm1, %v973_v37 }
  0x72   :  { %918 = vmatmul.msk.bf16.gmra.mxu0 %vm260_vm1, %v950_v26  ;;  %926 = vmatmul.msk.bf16.gmra.mxu1 %vm260_vm1, %v958_v27 }
  0x73   :  { %934 = vmatmul.msk.bf16.gmra.mxu2 %vm260_vm1, %v966_v32  ;;  %942 = vmatmul.msk.bf16.gmra.mxu3 %vm260_vm1, %v974_v48 }
  0x82   :  { %919 = vmatmul.msk.bf16.gmra.mxu0 %vm260_vm1, %v951_v30  ;;  %927 = vmatmul.msk.bf16.gmra.mxu1 %vm260_vm1, %v959_v31 }
  0x83   :  { %935 = vmatmul.msk.bf16.gmra.mxu2 %vm260_vm1, %v967_v36  ;;  %943 = vmatmul.msk.bf16.gmra.mxu3 %vm260_vm1, %v975_v60 }
  0x8f   :  { %v370_v34 = vpop.f32.mrf.mxu0  ;;  %v1186_v35 = vpop.f32.mrf.mxu1 }
  0x90   :  { %v609_v39 = vmul.f32 %v370_v34, %v370_v34 }
  0x96   :  { %v1206_v56 = vpop.f32.mrf.mxu2  ;;  %v1224_v7 = vpop.f32.mrf.mxu3 }
  0x97   :  { %v372_v38 = vpop.f32.mrf.mxu0  ;;  %v1196_v42 = vpop.f32.mrf.mxu1 }
  0x98   :  { %v537_v40 = vadd.f32 %v372_v38, %v370_v34  ;;  %v610_v41 = vmul.f32 %v372_v38, %v372_v38 }
  0x9a   :  { %v673_v43 = vadd.f32 %v610_v41, %v609_v39 }
  0x9e   :  { %v1214_v63 = vpop.f32.mrf.mxu2  ;;  %v1230_v11 = vpop.f32.mrf.mxu3 }
  0x9f   :  { %v375_v44 = vpop.f32.mrf.mxu0  ;;  %v1201_v49 = vpop.f32.mrf.mxu1 }
  0xa0   :  { %v538_v45 = vadd.f32 %v537_v40, %v375_v44  ;;  %v611_v46 = vmul.f32 %v375_v44, %v375_v44 }
  0xa2   :  { %v674_v47 = vadd.f32 %v673_v43, %v611_v46 }
  0xa6   :  { %v1218_v2 = vpop.f32.mrf.mxu2  ;;  %v1236_v15 = vpop.f32.mrf.mxu3 }
  0xa7   :  { %v377_v50 = vpop.f32.mrf.mxu0  ;;  %v1204_v54 = vpop.f32.mrf.mxu1 }
  0xa8   :  { %v539_v51 = vadd.f32 %v538_v45, %v377_v50  ;;  %v612_v52 = vmul.f32 %v377_v50, %v377_v50 }
  0xaa   :  { %v675_v53 = vadd.f32 %v674_v47, %v612_v52 }
  0xae   :  { %v1222_v5 = vpop.f32.mrf.mxu2  ;;  %v1242_v19 = vpop.f32.mrf.mxu3 }
  0xaf   :  { %v380_v55 = vpop.f32.mrf.mxu0  ;;  %v1212_v62 = vpop.f32.mrf.mxu1 }
  0xb0   :  { %v540_v57 = vadd.f32 %v539_v51, %v380_v55  ;;  %v613_v58 = vmul.f32 %v380_v55, %v380_v55 }
  0xb2   :  { %v676_v59 = vadd.f32 %v675_v53, %v613_v58 }
  0xb6   :  { %v1228_v10 = vpop.f32.mrf.mxu2  ;;  %v1248_v30 = vpop.f32.mrf.mxu3 }
  0xb7   :  { %v382_v61 = vpop.f32.mrf.mxu0  ;;  %v1216_v1 = vpop.f32.mrf.mxu1 }
  0xb8   :  { %v614_v21 = vmul.f32 %v382_v61, %v382_v61  ;;  %v541_v23 = vadd.f32 %v540_v57, %v382_v61 }
  0xba   :  { %v677_v26 = vadd.f32 %v676_v59, %v614_v21 }
  0xbe   :  { %v1234_v14 = vpop.f32.mrf.mxu2  ;;  %v1254_v52 = vpop.f32.mrf.mxu3 }
  0xbf   :  { %v385_v0 = vpop.f32.mrf.mxu0  ;;  %v1220_v4 = vpop.f32.mrf.mxu1 }
  0xc0   :  { %v615_v24 = vmul.f32 %v385_v0, %v385_v0  ;;  %v542_v27 = vadd.f32 %v541_v23, %v385_v0 }
  0xc2   :  { %v678_v31 = vadd.f32 %v677_v26, %v615_v24 }
  0xc6   :  { %v1240_v18 = vpop.f32.mrf.mxu2 }
  0xc7   :  { %v387_v3 = vpop.f32.mrf.mxu0  ;;  %v1226_v8 = vpop.f32.mrf.mxu1 }
  0xc8   :  { %v616_v28 = vmul.f32 %v387_v3, %v387_v3  ;;  %v543_v32 = vadd.f32 %v542_v27, %v387_v3  ;;  %v626_v27 = vmul.f32 %v1196_v42, %v1196_v42 }
  0xca   :  { %v679_v34 = vadd.f32 %v678_v31, %v616_v28  ;;  %v627_v31 = vmul.f32 %v1201_v49, %v1201_v49 }
  0xce   :  { %v1246_v25 = vpop.f32.mrf.mxu2 }
  0xcf   :  { %v390_v6 = vpop.f32.mrf.mxu0  ;;  %v1232_v13 = vpop.f32.mrf.mxu1 }
  0xd0   :  { %v617_v33 = vmul.f32 %v390_v6, %v390_v6  ;;  %v544_v36 = vadd.f32 %v543_v32, %v390_v6 }
  0xd2   :  { %v680_v38 = vadd.f32 %v679_v34, %v617_v33  ;;  %v628_v34 = vmul.f32 %v1204_v54, %v1204_v54 }
  0xd6   :  { %v1252_v47 = vpop.f32.mrf.mxu2 }
  0xd7   :  { %v392_v9 = vpop.f32.mrf.mxu0  ;;  %v1238_v17 = vpop.f32.mrf.mxu1 }
  0xd8   :  { %v618_v37 = vmul.f32 %v392_v9, %v392_v9  ;;  %v545_v39 = vadd.f32 %v544_v36, %v392_v9 }
  0xda   :  { %v681_v43 = vadd.f32 %v680_v38, %v618_v37  ;;  %v629_v38 = vmul.f32 %v1212_v62, %v1212_v62 }
  0xde   :  { %v1256_v23 = vpop.f32.mrf.mxu2 }
  0xdf   :  { %v395_v12 = vpop.f32.mrf.mxu0  ;;  %v1244_v22 = vpop.f32.mrf.mxu1 }
  0xe0   :  { %v619_v40 = vmul.f32 %v395_v12, %v395_v12  ;;  %v546_v44 = vadd.f32 %v545_v39, %v395_v12 }
  0xe2   :  { %v682_v48 = vadd.f32 %v681_v43, %v619_v40  ;;  %v630_v43 = vmul.f32 %v1216_v1, %v1216_v1 }
  0xe6   :  { %v1275_v40 = vpop.f32.mrf.mxu2 }
  0xe7   :  { %v397_v16 = vpop.f32.mrf.mxu0  ;;  %v1250_v41 = vpop.f32.mrf.mxu1 }
  0xe8   :  { %v620_v45 = vmul.f32 %v397_v16, %v397_v16  ;;  %v547_v50 = vadd.f32 %v546_v44, %v397_v16  ;;  %v625_v16 = vmul.f32 %v1186_v35, %v1186_v35 }
  0xea   :  { %v683_v53 = vadd.f32 %v682_v48, %v620_v45 }
  0xef   :  { %v400_v20 = vpop.f32.mrf.mxu0  ;;  %v440_v6 = vpop.f32.mrf.mxu1 }
  0xf0   :  { %v621_v51 = vmul.f32 %v400_v20, %v400_v20  ;;  %v548_v55 = vadd.f32 %v547_v50, %v400_v20  ;;  %v1261_v20 = vpop.f32.mrf.mxu3 }
  0xf2   :  { %v684_v58 = vadd.f32 %v683_v53, %v621_v51  ;;  %v633_v53 = vmul.f32 %v1232_v13, %v1232_v13 }
  0xf7   :  { %v402_v29 = vpop.f32.mrf.mxu0  ;;  %v442_v37 = vpop.f32.mrf.mxu1 }
  0xf8   :  { %v622_v57 = vmul.f32 %v402_v29, %v402_v29  ;;  %v549_v59 = vadd.f32 %v548_v55, %v402_v29  ;;  %v1280_v45 = vpop.f32.mrf.mxu3 }
  0xfa   :  { %v685_v61 = vadd.f32 %v684_v58, %v622_v57  ;;  %v634_v58 = vmul.f32 %v1238_v17, %v1238_v17 }
  0xff   :  { %v405_v46 = vpop.f32.mrf.mxu0  ;;  %v445_v57 = vpop.f32.mrf.mxu1 }
 0x100   :  { %v623_v60 = vmul.f32 %v405_v46, %v405_v46  ;;  %v550_v0 = vadd.f32 %v549_v59, %v405_v46 }
 0x102   :  { %v686_v9 = vadd.f32 %v685_v61, %v623_v60  ;;  %v635_v61 = vmul.f32 %v1244_v22, %v1244_v22 }
 0x107   :  { %v407_v3 = vpop.f32.mrf.mxu0 }
 0x108   :  { %v551_v12 = vadd.f32 %v550_v0, %v407_v3  ;;  %v624_v21 = vmul.f32 %v407_v3, %v407_v3  ;;  %v1297_v3 = vpop.f32.mrf.mxu3 }
 0x10a   :  { %v552_v24 = vadd.f32 %v551_v12, %v1186_v35  ;;  %v687_v26 = vadd.f32 %v686_v9, %v624_v21 }
 0x10c   :  { %v553_v28 = vadd.f32 %v552_v24, %v1196_v42  ;;  %v688_v29 = vadd.f32 %v687_v26, %v625_v16  ;;  %v637_v16 = vmul.f32 %v440_v6, %v440_v6 }
 0x10e   :  { %v554_v32 = vadd.f32 %v553_v28, %v1201_v49  ;;  %v689_v33 = vadd.f32 %v688_v29, %v626_v27  ;;  %v638_v27 = vmul.f32 %v442_v37, %v442_v37  ;;  %v447_v28 = vpop.f32.mrf.mxu1 }
 0x110   :  { %v555_v35 = vadd.f32 %v554_v32, %v1204_v54  ;;  %v690_v36 = vadd.f32 %v689_v33, %v627_v31  ;;  %v631_v54 = vmul.f32 %v1220_v4, %v1220_v4  ;;  %v639_v32 = vmul.f32 %v445_v57, %v445_v57 }
 0x112   :  { %v556_v39 = vadd.f32 %v555_v35, %v1212_v62  ;;  %v691_v42 = vadd.f32 %v690_v36, %v628_v34  ;;  %v632_v62 = vmul.f32 %v1226_v8, %v1226_v8  ;;  %v640_v35 = vmul.f32 %v447_v28, %v447_v28  ;;  %v1302_v36 = vpop.f32.mrf.mxu3 }
 0x114   :  { %v557_v49 = vadd.f32 %v556_v39, %v1216_v1  ;;  %v692_v44 = vadd.f32 %v691_v42, %v629_v38  ;;  %v642_v39 = vmul.f32 %v1214_v63, %v1214_v63 }
 0x116   :  { %v693_v46 = vadd.f32 %v692_v44, %v630_v43  ;;  %v558_v48 = vadd.f32 %v557_v49, %v1220_v4  ;;  %v477_v4 = vpop.f32.mrf.mxu2  ;;  %v643_v43 = vmul.f32 %v1218_v2, %v1218_v2 }
 0x118   :  { %v559_v50 = vadd.f32 %v558_v48, %v1226_v8  ;;  %v694_v51 = vadd.f32 %v693_v46, %v631_v54  ;;  %v644_v54 = vmul.f32 %v1222_v5, %v1222_v5 }
 0x11a   :  { %v560_v1 = vadd.f32 %v559_v50, %v1232_v13  ;;  %v695_v55 = vadd.f32 %v694_v51, %v632_v62  ;;  %v636_v13 = vmul.f32 %v1250_v41, %v1250_v41  ;;  %v645_v62 = vmul.f32 %v1228_v10, %v1228_v10  ;;  %v1319_v51 = vpop.f32.mrf.mxu3 }
 0x11c   :  { %v561_v59 = vadd.f32 %v560_v1, %v1238_v17  ;;  %v696_v60 = vadd.f32 %v695_v55, %v633_v53  ;;  %v646_v53 = vmul.f32 %v1234_v14, %v1234_v14  ;;  %v647_v55 = vmul.f32 %v1240_v18, %v1240_v18 }
 0x11e   :  { %v562_v8 = vadd.f32 %v561_v59, %v1244_v22  ;;  %v697_v0 = vadd.f32 %v696_v60, %v634_v58  ;;  %v480_v22 = vpop.f32.mrf.mxu2  ;;  %v648_v58 = vmul.f32 %v1246_v25, %v1246_v25  ;;  %v649_v60 = vmul.f32 %v1252_v47, %v1252_v47 }
 0x120   :  { %v563_v9 = vadd.f32 %v562_v8, %v1250_v41  ;;  %v698_v12 = vadd.f32 %v697_v0, %v635_v61  ;;  %v641_v41 = vmul.f32 %v1206_v56, %v1206_v56  ;;  %v650_v0 = vmul.f32 %v1256_v23, %v1256_v23 }
 0x122   :  { %v564_v21 = vadd.f32 %v563_v9, %v440_v6  ;;  %v699_v24 = vadd.f32 %v698_v12, %v636_v13  ;;  %v651_v12 = vmul.f32 %v1275_v40, %v1275_v40 }
 0x124   :  { %v700_v17 = vadd.f32 %v699_v24, %v637_v16  ;;  %v565_v26 = vadd.f32 %v564_v21, %v442_v37  ;;  %v652_v24 = vmul.f32 %v477_v4, %v477_v4 }
 0x126   :  { %v701_v29 = vadd.f32 %v700_v17, %v638_v27  ;;  %v566_v31 = vadd.f32 %v565_v26, %v445_v57  ;;  %v653_v27 = vmul.f32 %v480_v22, %v480_v22 }
 0x128   :  { %v702_v33 = vadd.f32 %v701_v29, %v639_v32  ;;  %v567_v34 = vadd.f32 %v566_v31, %v447_v28 }
 0x12a   :  { %v568_v38 = vadd.f32 %v567_v34, %v1206_v56  ;;  %v703_v6 = vadd.f32 %v702_v33, %v640_v35  ;;  %v482_v56 = vpop.f32.mrf.mxu2 }
 0x12b   :  { %v654_v31 = vmul.f32 %v482_v56, %v482_v56 }
 0x12c   :  { %v569_v37 = vadd.f32 %v568_v38, %v1214_v63  ;;  %v704_v42 = vadd.f32 %v703_v6, %v641_v41 }
 0x12e   :  { %v570_v49 = vadd.f32 %v569_v37, %v1218_v2  ;;  %v705_v44 = vadd.f32 %v704_v42, %v642_v39 }
 0x130   :  { %v571_v46 = vadd.f32 %v570_v49, %v1222_v5  ;;  %v706_v48 = vadd.f32 %v705_v44, %v643_v43  ;;  %v659_v43 = vmul.f32 %v1236_v15, %v1236_v15 }
 0x132   :  { %v572_v50 = vadd.f32 %v571_v46, %v1228_v10  ;;  %v707_v63 = vadd.f32 %v706_v48, %v644_v54  ;;  %v1042_v54 = vmov 0.0   ;;  %v660_v46 = vmul.f32 %v1242_v19, %v1242_v19 }
 0x133   :  { %534 = vst [vmem:[#allocation2] sm:$0x1] %v1042_v54 }
 0x134   :  { %v573_v2 = vadd.f32 %v572_v50, %v1234_v14  ;;  %v708_v1 = vadd.f32 %v707_v63, %v645_v62  ;;  %v485_v14 = vpop.f32.mrf.mxu2  ;;  %535 = vst [vmem:[#allocation4] sm:$0x1] %v1042_v54 }
 0x135   :  { %v655_v34 = vmul.f32 %v485_v14, %v485_v14 }
 0x136   :  { %v709_v5 = vadd.f32 %v708_v1, %v646_v53  ;;  %v574_v57 = vadd.f32 %v573_v2, %v1240_v18  ;;  %v517_v18 = vpop.f32.mrf.mxu3  ;;  %v663_v2 = vmul.f32 %v1261_v20, %v1261_v20 }
 0x138   :  { %v575_v10 = vadd.f32 %v574_v57, %v1246_v25  ;;  %v710_v59 = vadd.f32 %v709_v5, %v647_v55  ;;  %v664_v55 = vmul.f32 %v1280_v45, %v1280_v45 }
 0x13a   :  { %v576_v61 = vadd.f32 %v575_v10, %v1252_v47  ;;  %v711_v8 = vadd.f32 %v710_v59, %v648_v58  ;;  %v666_v59 = vmul.f32 %v1302_v36, %v1302_v36 }
 0x13c   :  { %v577_v13 = vadd.f32 %v576_v61, %v1256_v23  ;;  %v712_v9 = vadd.f32 %v711_v8, %v649_v60  ;;  %v487_v32 = vpop.f32.mrf.mxu2 }
 0x13d   :  { %v656_v6 = vmul.f32 %v487_v32, %v487_v32 }
 0x13e   :  { %v578_v25 = vadd.f32 %v577_v13, %v1275_v40  ;;  %v713_v21 = vadd.f32 %v712_v9, %v650_v0  ;;  %v520_v35 = vpop.f32.mrf.mxu3  ;;  %v657_v40 = vmul.f32 %v1224_v7, %v1224_v7  ;;  %v668_v0 = vmul.f32 %v517_v18, %v517_v18 }
 0x140   :  { %v579_v16 = vadd.f32 %v578_v25, %v477_v4  ;;  %v714_v17 = vadd.f32 %v713_v21, %v651_v12 }
 0x142   :  { %v715_v26 = vadd.f32 %v714_v17, %v652_v24  ;;  %v580_v47 = vadd.f32 %v579_v16, %v480_v22  ;;  %v658_v22 = vmul.f32 %v1230_v11, %v1230_v11 }
 0x144   :  { %v716_v28 = vadd.f32 %v715_v26, %v653_v27  ;;  %v581_v29 = vadd.f32 %v580_v47, %v482_v56 }
 0x146   :  { %v717_v33 = vadd.f32 %v716_v28, %v654_v31  ;;  %v582_v23 = vadd.f32 %v581_v29, %v485_v14  ;;  %v522_v56 = vpop.f32.mrf.mxu3 }
 0x147   :  { %v670_v16 = vmul.f32 %v522_v56, %v522_v56 }
 0x148   :  { %v718_v41 = vadd.f32 %v717_v33, %v655_v34  ;;  %v583_v38 = vadd.f32 %v582_v23, %v487_v32 }
 0x14a   :  { %v584_v4 = vadd.f32 %v583_v38, %v1224_v7  ;;  %v719_v39 = vadd.f32 %v718_v41, %v656_v6  ;;  %v536_v38 = vld [vmem:[#allocation2] sm:$0x1] }
 0x14c   :  { %v585_v37 = vadd.f32 %v584_v4, %v1230_v11  ;;  %v720_v42 = vadd.f32 %v719_v39, %v657_v40  ;;  %v661_v11 = vmul.f32 %v1248_v30, %v1248_v30  ;;  %v608_v4 = vld [vmem:[#allocation4] sm:$0x1] }
 0x14e   :  { %v586_v49 = vadd.f32 %v585_v37, %v1236_v15  ;;  %v721_v44 = vadd.f32 %v720_v42, %v658_v22  ;;  %v662_v15 = vmul.f32 %v1254_v52, %v1254_v52 }
 0x150   :  { %v587_v7 = vadd.f32 %v586_v49, %v1242_v19  ;;  %v722_v48 = vadd.f32 %v721_v44, %v659_v43 }
 0x152   :  { %v588_v62 = vadd.f32 %v587_v7, %v1248_v30  ;;  %v723_v50 = vadd.f32 %v722_v48, %v660_v46  ;;  %v665_v30 = vmul.f32 %v1297_v3, %v1297_v3 }
 0x154   :  { %v589_v63 = vadd.f32 %v588_v62, %v1254_v52  ;;  %v724_v53 = vadd.f32 %v723_v50, %v661_v11  ;;  %v525_v52 = vpop.f32.mrf.mxu3 }
 0x156   :  { %v725_v1 = vadd.f32 %v724_v53, %v662_v15  ;;  %v590_v19 = vadd.f32 %v589_v63, %v1261_v20  ;;  %v667_v20 = vmul.f32 %v1319_v51, %v1319_v51 }
 0x158   :  { %v591_v5 = vadd.f32 %v590_v19, %v1280_v45  ;;  %v726_v57 = vadd.f32 %v725_v1, %v663_v2 }
 0x15a   :  { %v592_v58 = vadd.f32 %v591_v5, %v1297_v3  ;;  %v727_v10 = vadd.f32 %v726_v57, %v664_v55  ;;  %v669_v3 = vmul.f32 %v520_v35, %v520_v35 }
 0x15c   :  { %v593_v60 = vadd.f32 %v592_v58, %v1302_v36  ;;  %v728_v61 = vadd.f32 %v727_v10, %v665_v30  ;;  %v527_v24 = vpop.f32.mrf.mxu3  ;;  %v671_v36 = vmul.f32 %v525_v52, %v525_v52 }
 0x15d   :  { %v672_v28 = vmul.f32 %v527_v24, %v527_v24 }
 0x15e   :  { %v594_v8 = vadd.f32 %v593_v60, %v1319_v51  ;;  %v729_v45 = vadd.f32 %v728_v61, %v666_v59 }
 0x160   :  { %v595_v14 = vadd.f32 %v594_v8, %v517_v18  ;;  %v730_v13 = vadd.f32 %v729_v45, %v667_v20 }
 0x162   :  { %v731_v9 = vadd.f32 %v730_v13, %v668_v0  ;;  %v596_v12 = vadd.f32 %v595_v14, %v520_v35 }
 0x164   :  { %v732_v25 = vadd.f32 %v731_v9, %v669_v3  ;;  %v597_v21 = vadd.f32 %v596_v12, %v522_v56 }
 0x166   :  { %v733_v17 = vadd.f32 %v732_v25, %v670_v16  ;;  %v598_v26 = vadd.f32 %v597_v21, %v525_v52 }
 0x168   :  { %v734_v47 = vadd.f32 %v733_v17, %v671_v36  ;;  %v599_v27 = vadd.f32 %v598_v26, %v527_v24 }
 0x16a   :  { %v600_v29 = vrot.slane %v599_v27, 4  ;;  %v735_v31 = vadd.f32 %v734_v47, %v672_v28 }
 0x16c   :  { %v601_v51 = vadd.f32 %v600_v29, %v599_v27  ;;  %v736_v32 = vrot.slane %v735_v31, 4 }
 0x16e   :  { %v602_v33 = vrot.slane %v601_v51, 2  ;;  %v737_v18 = vadd.f32 %v736_v32, %v735_v31 }
 0x170   :  { %v603_v23 = vadd.f32 %v602_v33, %v601_v51  ;;  %v738_v34 = vrot.slane %v737_v18, 2 }
 0x172   :  { %v604_v41 = vrot.slane %v603_v23, 1  ;;  %v739_v35 = vadd.f32 %v738_v34, %v737_v18 }
 0x174   :  { %v605_v6 = vadd.f32 %v604_v41, %v603_v23  ;;  %v740_v40 = vrot.slane %v739_v35, 1 }
 0x176   :  { %v741_v39 = vadd.f32 %v740_v40, %v739_v35  ;;  %v606_v22 = vadd.f32 %v605_v6, %v536_v38 }
 0x178   :  { %607 = vst [vmem:[#allocation2] sm:$0x1] %v606_v22  ;;  %v742_v37 = vadd.f32 %v741_v39, %v608_v4 }
 0x179   :  { %754 = dma.vmem_to_hbm [thread:$0]  %s750_s25, 16, %s752_s28, [#allocation3]  }
 0x17a   :  { %743 = vst [vmem:[#allocation4] sm:$0x1] %v742_v37 }
 0x17b   :  { %765 = dma.vmem_to_hbm [thread:$0]  %s761_s30, 16, %s763_s6, [#allocation5]  }
 0x17c   :  { %1038 = dma.done.wait [#allocation3], 16  }
 0x17d   :  { %1039 = vsyncadd [#allocation3], 4294967280 }
 0x17e   :  { %1040 = dma.done.wait [#allocation5], 16  }
 0x17f   :  { %1041 = vsyncadd [#allocation5], 4294967280 }
 0x180   :  { %774 = vsyncpa [#allocation3], 1 }
 0x181   :  { %775 = vsyncpa [#allocation5], 1 }

</bundles_post_ra>
